<compile_context>
chip_gen: v5e
topology: v5e:2x2
jax: 0.10.0
libtpu: 0.0.40
codegen_flags: <defaults>
</compile_context>

<pallas_src>
import jax
import jax.numpy as jnp
import numpy as np
from jax.experimental import pallas as pl
from jax.experimental.pallas import tpu as pltpu

# --- model geometry (fixed by the PyTorch module: FC1 expects 9*9*8 inputs) ---
IN_H = IN_W = 28
K, STRIDE = 4, 3
C_OUT = 8
OUT_H = OUT_W = 9                       # (28 - 4) // 3 + 1
CONV_FEATS = C_OUT * OUT_H * OUT_W      # 648
HIDDEN, N_CLASSES = 64, 10

LANE = 128                              # TPU lane width
STRIP_K = K * IN_W                      # 112 pixels feeding one conv output row
STRIP_N = C_OUT * OUT_W                 # 72 real outputs per row (padded to 128)
FEATS_PAD = OUT_H * LANE                # 1152 lane-dense conv feature axis
HIDDEN_PAD = LANE                       # 64  -> 128
CLASSES_PAD = LANE                      # 10  -> 128


# ----------------------------------------------------------------------------
# Fused Pallas kernel: 9 strip matmuls (conv) + square -> FC1 + square -> FC2
# ----------------------------------------------------------------------------
def m1_fused_kernel(x_ref, ws_ref, bc_ref, w1_ref, b1_ref, w2_ref, b2_ref, o_ref):
    """Whole M1 forward for one batch tile; intermediates stay in vregs/VMEM.

    x:(bm,784) f32   ws:(112,128) bf16   w1:(1152,128) bf16   w2:(128,128) bf16
    biases: f32      o:(bm,128) f32 (cols 10..127 are zero padding)
    """
    x = x_ref[...]
    ws = ws_ref[...]
    # Conv2d(1->8, k=4, s=3): output row i depends only on input rows 3i..3i+3,
    # i.e. the contiguous 112 pixels x_flat[:, 84*i : 84*i+112], and the linear
    # map is identical for every i -> 9 shared-weight MXU matmuls.
    parts = []
    for i in range(OUT_H):
        xs = x[:, STRIDE * IN_W * i: STRIDE * IN_W * i + STRIP_K].astype(jnp.bfloat16)
        parts.append(jnp.dot(xs, ws, preferred_element_type=jnp.float32))
    h = jnp.concatenate(parts, axis=-1)                 # (bm, 1152); order i*128 + c*9 + j
    h = h + bc_ref[...]
    h = h * h                                           # Square1 (f32 on the VPU)
    h = jnp.dot(h.astype(jnp.bfloat16), w1_ref[...],
                preferred_element_type=jnp.float32)     # FC1 (rows pre-permuted offline)
    h = h + b1_ref[...]
    h = h * h                                           # Square2 (f32)
    h = jnp.dot(h.astype(jnp.bfloat16), w2_ref[...],
                preferred_element_type=jnp.float32)     # FC2
    o_ref[...] = (h + b2_ref[...]).astype(o_ref.dtype)


def _round_up(x, m):
    return ((x + m - 1) // m) * m


def _pick_bm(B, batch_tile):
    if B <= 8:
        return B                              # single tile; bm == full batch dim is legal
    # keep >= 2 grid steps so the "parallel" batch axis shards across v7x's 2 TCs;
    # bm is a multiple of 8 (sublane alignment), capped by batch_tile.
    return min(batch_tile, _round_up(pl.cdiv(B, 2), 8))


def m1_forward(x_flat, kp, *, batch_tile=512):
    """x_flat: (B, 784) f32; kp: kernel-ready params (see prepare_params)."""
    B, F = x_flat.shape
    assert F == IN_H * IN_W
    bm = _pick_bm(B, batch_tile)
    B_pad = pl.cdiv(B, bm) * bm
    if B_pad != B:
        x_flat = jnp.pad(x_flat, ((0, B_pad - B), (0, 0)))   # ragged batch: pad, don't assert
    grid = (B_pad // bm,)

    def _const(shape):
        # Grid-invariant operand: same block every step; single-buffered
        # (double-buffering something that is never re-fetched is pure VMEM waste).
        return pl.BlockSpec(shape, lambda i: (0, 0), pipeline_mode=pl.Buffered(1))

    w_bytes = sum(int(np.prod(kp[k].shape)) * kp[k].dtype.itemsize
                  for k in ("ws", "bc", "w1", "b1", "w2", "b2"))
    cost = pl.CostEstimate(
        flops=2 * B_pad * (OUT_H * STRIP_K * LANE
                           + FEATS_PAD * HIDDEN_PAD
                           + HIDDEN_PAD * CLASSES_PAD),
        transcendentals=0,
        bytes_accessed=B_pad * F * 4 + B_pad * CLASSES_PAD * 4 + w_bytes)

    out = pl.pallas_call(
        m1_fused_kernel,
        out_shape=jax.ShapeDtypeStruct((B_pad, CLASSES_PAD), jnp.float32),
        grid_spec=pltpu.PrefetchScalarGridSpec(
            num_scalar_prefetch=0,
            grid=grid,
            in_specs=[
                pl.BlockSpec((bm, F), lambda i: (i, 0)),      # activations (batch-tiled)
                _const((STRIP_K, LANE)),                      # folded conv strip W (bf16)
                _const((1, FEATS_PAD)),                       # conv bias (f32, padded)
                _const((FEATS_PAD, HIDDEN_PAD)),              # FC1 W^T, row-permuted (bf16)
                _const((1, HIDDEN_PAD)),                      # FC1 bias (f32, padded)
                _const((HIDDEN_PAD, CLASSES_PAD)),            # FC2 W^T (bf16, padded)
                _const((1, CLASSES_PAD)),                     # FC2 bias (f32, padded)
            ],
            out_specs=pl.BlockSpec((bm, CLASSES_PAD), lambda i: (i, 0)),
        ),
        compiler_params=pltpu.CompilerParams(
            dimension_semantics=("parallel",)),
        cost_estimate=cost,
    )(x_flat, kp["ws"], kp["bc"], kp["w1"], kp["b1"], kp["w2"], kp["b2"])
    return out[:B, :N_CLASSES]


# ----------------------------------------------------------------------------
# One-time (outside jit) weight folding
# ----------------------------------------------------------------------------
def prepare_params(p):
    """Fold the strided conv into a shared (112,128) 'strip' matrix, permute/pad
    the FC weights to the kernel's lane-dense layout, cast matmul weights to bf16."""
    w = np.asarray(p["w_conv"], np.float32)        # (8, 1, 4, 4)
    b = np.asarray(p["b_conv"], np.float32)        # (8,)

    # Strip weight: within one output row, output (c, j) reads strip-local pixel
    # di*28 + 3*j + dj.  Identical for all 9 output rows (shift invariance).
    ws = np.zeros((STRIP_K, LANE), np.float32)     # 72 real cols, lanes 72..127 zero
    for c in range(C_OUT):
        for j in range(OUT_W):
            col = c * OUT_W + j
            for di in range(K):
                for dj in range(K):
                    ws[di * IN_W + STRIDE * j + dj, col] = w[c, 0, di, dj]

    # Conv bias, laid out in the kernel's intermediate order k = i*128 + c*9 + j.
    bc = np.zeros((1, FEATS_PAD), np.float32)
    for i in range(OUT_H):
        for c in range(C_OUT):
            s = i * LANE + c * OUT_W
            bc[0, s:s + OUT_W] = b[c]

    # FC1: permute rows from PyTorch flatten order f = c*81 + i*9 + j to the
    # kernel order k = i*128 + c*9 + j; pad K to 1152 and N to 128 with zeros.
    wfc1 = np.asarray(p["wfc1"], np.float32)       # (64, 648)
    w1 = np.zeros((FEATS_PAD, HIDDEN_PAD), np.float32)
    for c in range(C_OUT):
        for i in range(OUT_H):
            for j in range(OUT_W):
                w1[i * LANE + c * OUT_W + j, :HIDDEN] = \
                    wfc1[:, (c * OUT_H + i) * OUT_W + j]
    b1 = np.zeros((1, HIDDEN_PAD), np.float32)
    b1[0, :HIDDEN] = np.asarray(p["bfc1"], np.float32)

    # FC2: pad to (128, 128) so the final store is a full unmasked lane slab.
    w2 = np.zeros((HIDDEN_PAD, CLASSES_PAD), np.float32)
    w2[:HIDDEN, :N_CLASSES] = np.asarray(p["wfc2"], np.float32).T
    b2 = np.zeros((1, CLASSES_PAD), np.float32)
    b2[0, :N_CLASSES] = np.asarray(p["bfc2"], np.float32)

    return {
        "ws": jnp.asarray(ws, jnp.bfloat16),
        "bc": jnp.asarray(bc),
        "w1": jnp.asarray(w1, jnp.bfloat16),
        "b1": jnp.asarray(b1),
        "w2": jnp.asarray(w2, jnp.bfloat16),
        "b2": jnp.asarray(b2),
    }


# ----------------------------------------------------------------------------
# Pure-JAX f32 reference (raw PyTorch-layout params)
# ----------------------------------------------------------------------------
def ref_forward(x, p):
    y = jax.lax.conv_general_dilated(
        x, p["w_conv"], window_strides=(STRIDE, STRIDE), padding="VALID",
        dimension_numbers=("NCHW", "OIHW", "NCHW"))
    y = y + p["b_conv"][None, :, None, None]
    y = y * y
    y = y.reshape(y.shape[0], -1)
    y = y @ p["wfc1"].T + p["bfc1"]
    y = y * y
    y = y @ p["wfc2"].T + p["bfc2"]
    return y


# ----------------------------------------------------------------------------
# main
# ----------------------------------------------------------------------------
if __name__ == "__main__":
    B = 2
    key = jax.random.PRNGKey(0)
    ks = jax.random.split(key, 7)

    def init(k, shape, scale=0.1):
        return (scale * jax.random.normal(k, shape)).astype(jnp.float32)

    params = {
        "w_conv": init(ks[0], (C_OUT, 1, K, K)),
        "b_conv": init(ks[1], (C_OUT,)),
        "wfc1":  init(ks[2], (HIDDEN, CONV_FEATS)),
        "bfc1":  init(ks[3], (HIDDEN,)),
        "wfc2":  init(ks[4], (N_CLASSES, HIDDEN)),
        "bfc2":  init(ks[5], (N_CLASSES,)),
    }
    x = jax.random.normal(ks[6], (B, 1, IN_H, IN_W), dtype=jnp.float32)

    # one-time weight folding (outside jit -> never re-executed per forward)
    kparams = prepare_params(params)

    @jax.jit
    def forward(x_nchw, kp):
        return m1_forward(x_nchw.reshape(x_nchw.shape[0], -1), kp)

    y = jax.block_until_ready(forward(x, kparams))
    y_ref = jax.block_until_ready(ref_forward(x, params))

    assert y.shape == (B, N_CLASSES), y.shape
    # bf16 MXU operands (f32 accumulation) through two squaring nonlinearities:
    # relaxed tolerance vs the pure-f32 reference; layout bugs would still be O(0.1+).
    np.testing.assert_allclose(np.asarray(y), np.asarray(y_ref),
                               rtol=5e-2, atol=4e-2)
    print("KERNEL_OK")
</pallas_src>

<mosaic_0001>
module attributes {stable_mosaic.version = 11 : i64} {
  func.func @m1_fused_kernel(%arg0: i32, %arg1: memref<2x784xf32, #tpu.memory_space<vmem>>, %arg2: memref<112x128xbf16, #tpu.memory_space<vmem>>, %arg3: memref<1x1152xf32, #tpu.memory_space<vmem>>, %arg4: memref<1152x128xbf16, #tpu.memory_space<vmem>>, %arg5: memref<1x128xf32, #tpu.memory_space<vmem>>, %arg6: memref<128x128xbf16, #tpu.memory_space<vmem>>, %arg7: memref<1x128xf32, #tpu.memory_space<vmem>>, %arg8: memref<2x128xf32, #tpu.memory_space<vmem>>) attributes {dimension_semantics = [#tpu.dimension_semantics<parallel>], iteration_bounds = array<i64: 1>, scalar_prefetch = 0 : i64, scratch_operands = 0 : i64, tpu.core_type = #tpu.core_type<tc>, window_params = [{transform_indices = @transform_0, window_bounds = array<i64: 2, 784>}, {pipeline_mode = #tpu.pipeline_mode<synchronous>, transform_indices = @transform_1, window_bounds = array<i64: 112, 128>}, {pipeline_mode = #tpu.pipeline_mode<synchronous>, transform_indices = @transform_2, window_bounds = array<i64: 1, 1152>}, {pipeline_mode = #tpu.pipeline_mode<synchronous>, transform_indices = @transform_3, window_bounds = array<i64: 1152, 128>}, {pipeline_mode = #tpu.pipeline_mode<synchronous>, transform_indices = @transform_4, window_bounds = array<i64: 1, 128>}, {pipeline_mode = #tpu.pipeline_mode<synchronous>, transform_indices = @transform_5, window_bounds = array<i64: 128, 128>}, {pipeline_mode = #tpu.pipeline_mode<synchronous>, transform_indices = @transform_6, window_bounds = array<i64: 1, 128>}, {transform_indices = @transform_7, window_bounds = array<i64: 2, 128>}]} {
    %c0 = arith.constant 0 : index
    %c0_0 = arith.constant 0 : index
    %0 = vector.load %arg1[%c0, %c0_0] : memref<2x784xf32, #tpu.memory_space<vmem>>, vector<2x784xf32>
    %c0_1 = arith.constant 0 : index
    %c0_2 = arith.constant 0 : index
    %1 = vector.load %arg2[%c0_1, %c0_2] : memref<112x128xbf16, #tpu.memory_space<vmem>>, vector<112x128xbf16>
    %2 = vector.extract_strided_slice %0 {offsets = [0, 0], sizes = [2, 112], strides = [1, 1]} : vector<2x784xf32> to vector<2x112xf32>
    %3 = arith.truncf %2 : vector<2x112xf32> to vector<2x112xbf16>
    %cst = arith.constant dense<0.000000e+00> : vector<2x128xf32>
    %4 = tpu.matmul %3, %1, %cst {dimension_numbers = #tpu.dot_dimension_numbers<[1], [0], [0], [1], [0, 0, 1, 1], [], []>} : vector<2x112xbf16>, vector<112x128xbf16>, vector<2x128xf32> -> vector<2x128xf32>
    %5 = vector.extract_strided_slice %0 {offsets = [0, 84], sizes = [2, 112], strides = [1, 1]} : vector<2x784xf32> to vector<2x112xf32>
    %6 = arith.truncf %5 : vector<2x112xf32> to vector<2x112xbf16>
    %cst_3 = arith.constant dense<0.000000e+00> : vector<2x128xf32>
    %7 = tpu.matmul %6, %1, %cst_3 {dimension_numbers = #tpu.dot_dimension_numbers<[1], [0], [0], [1], [0, 0, 1, 1], [], []>} : vector<2x112xbf16>, vector<112x128xbf16>, vector<2x128xf32> -> vector<2x128xf32>
    %8 = vector.extract_strided_slice %0 {offsets = [0, 168], sizes = [2, 112], strides = [1, 1]} : vector<2x784xf32> to vector<2x112xf32>
    %9 = arith.truncf %8 : vector<2x112xf32> to vector<2x112xbf16>
    %cst_4 = arith.constant dense<0.000000e+00> : vector<2x128xf32>
    %10 = tpu.matmul %9, %1, %cst_4 {dimension_numbers = #tpu.dot_dimension_numbers<[1], [0], [0], [1], [0, 0, 1, 1], [], []>} : vector<2x112xbf16>, vector<112x128xbf16>, vector<2x128xf32> -> vector<2x128xf32>
    %11 = vector.extract_strided_slice %0 {offsets = [0, 252], sizes = [2, 112], strides = [1, 1]} : vector<2x784xf32> to vector<2x112xf32>
    %12 = arith.truncf %11 : vector<2x112xf32> to vector<2x112xbf16>
    %cst_5 = arith.constant dense<0.000000e+00> : vector<2x128xf32>
    %13 = tpu.matmul %12, %1, %cst_5 {dimension_numbers = #tpu.dot_dimension_numbers<[1], [0], [0], [1], [0, 0, 1, 1], [], []>} : vector<2x112xbf16>, vector<112x128xbf16>, vector<2x128xf32> -> vector<2x128xf32>
    %14 = vector.extract_strided_slice %0 {offsets = [0, 336], sizes = [2, 112], strides = [1, 1]} : vector<2x784xf32> to vector<2x112xf32>
    %15 = arith.truncf %14 : vector<2x112xf32> to vector<2x112xbf16>
    %cst_6 = arith.constant dense<0.000000e+00> : vector<2x128xf32>
    %16 = tpu.matmul %15, %1, %cst_6 {dimension_numbers = #tpu.dot_dimension_numbers<[1], [0], [0], [1], [0, 0, 1, 1], [], []>} : vector<2x112xbf16>, vector<112x128xbf16>, vector<2x128xf32> -> vector<2x128xf32>
    %17 = vector.extract_strided_slice %0 {offsets = [0, 420], sizes = [2, 112], strides = [1, 1]} : vector<2x784xf32> to vector<2x112xf32>
    %18 = arith.truncf %17 : vector<2x112xf32> to vector<2x112xbf16>
    %cst_7 = arith.constant dense<0.000000e+00> : vector<2x128xf32>
    %19 = tpu.matmul %18, %1, %cst_7 {dimension_numbers = #tpu.dot_dimension_numbers<[1], [0], [0], [1], [0, 0, 1, 1], [], []>} : vector<2x112xbf16>, vector<112x128xbf16>, vector<2x128xf32> -> vector<2x128xf32>
    %20 = vector.extract_strided_slice %0 {offsets = [0, 504], sizes = [2, 112], strides = [1, 1]} : vector<2x784xf32> to vector<2x112xf32>
    %21 = arith.truncf %20 : vector<2x112xf32> to vector<2x112xbf16>
    %cst_8 = arith.constant dense<0.000000e+00> : vector<2x128xf32>
    %22 = tpu.matmul %21, %1, %cst_8 {dimension_numbers = #tpu.dot_dimension_numbers<[1], [0], [0], [1], [0, 0, 1, 1], [], []>} : vector<2x112xbf16>, vector<112x128xbf16>, vector<2x128xf32> -> vector<2x128xf32>
    %23 = vector.extract_strided_slice %0 {offsets = [0, 588], sizes = [2, 112], strides = [1, 1]} : vector<2x784xf32> to vector<2x112xf32>
    %24 = arith.truncf %23 : vector<2x112xf32> to vector<2x112xbf16>
    %cst_9 = arith.constant dense<0.000000e+00> : vector<2x128xf32>
    %25 = tpu.matmul %24, %1, %cst_9 {dimension_numbers = #tpu.dot_dimension_numbers<[1], [0], [0], [1], [0, 0, 1, 1], [], []>} : vector<2x112xbf16>, vector<112x128xbf16>, vector<2x128xf32> -> vector<2x128xf32>
    %26 = vector.extract_strided_slice %0 {offsets = [0, 672], sizes = [2, 112], strides = [1, 1]} : vector<2x784xf32> to vector<2x112xf32>
    %27 = arith.truncf %26 : vector<2x112xf32> to vector<2x112xbf16>
    %cst_10 = arith.constant dense<0.000000e+00> : vector<2x128xf32>
    %28 = tpu.matmul %27, %1, %cst_10 {dimension_numbers = #tpu.dot_dimension_numbers<[1], [0], [0], [1], [0, 0, 1, 1], [], []>} : vector<2x112xbf16>, vector<112x128xbf16>, vector<2x128xf32> -> vector<2x128xf32>
    %29 = tpu.concatenate %4, %7, %10, %13, %16, %19, %22, %25, %28 in 1 : vector<2x128xf32>, vector<2x128xf32>, vector<2x128xf32>, vector<2x128xf32>, vector<2x128xf32>, vector<2x128xf32>, vector<2x128xf32>, vector<2x128xf32>, vector<2x128xf32> -> vector<2x1152xf32>
    %c0_11 = arith.constant 0 : index
    %c0_12 = arith.constant 0 : index
    %30 = vector.load %arg3[%c0_11, %c0_12] : memref<1x1152xf32, #tpu.memory_space<vmem>>, vector<1x1152xf32>
    %31 = vector.broadcast %30 : vector<1x1152xf32> to vector<2x1152xf32>
    %32 = arith.addf %29, %31 : vector<2x1152xf32>
    %33 = arith.mulf %32, %32 : vector<2x1152xf32>
    %34 = arith.truncf %33 : vector<2x1152xf32> to vector<2x1152xbf16>
    %c0_13 = arith.constant 0 : index
    %c0_14 = arith.constant 0 : index
    %35 = vector.load %arg4[%c0_13, %c0_14] : memref<1152x128xbf16, #tpu.memory_space<vmem>>, vector<1152x128xbf16>
    %cst_15 = arith.constant dense<0.000000e+00> : vector<2x128xf32>
    %36 = tpu.matmul %34, %35, %cst_15 {dimension_numbers = #tpu.dot_dimension_numbers<[1], [0], [0], [1], [0, 0, 1, 1], [], []>} : vector<2x1152xbf16>, vector<1152x128xbf16>, vector<2x128xf32> -> vector<2x128xf32>
    %c0_16 = arith.constant 0 : index
    %c0_17 = arith.constant 0 : index
    %37 = vector.load %arg5[%c0_16, %c0_17] : memref<1x128xf32, #tpu.memory_space<vmem>>, vector<1x128xf32>
    %38 = vector.broadcast %37 : vector<1x128xf32> to vector<2x128xf32>
    %39 = arith.addf %36, %38 : vector<2x128xf32>
    %40 = arith.mulf %39, %39 : vector<2x128xf32>
    %41 = arith.truncf %40 : vector<2x128xf32> to vector<2x128xbf16>
    %c0_18 = arith.constant 0 : index
    %c0_19 = arith.constant 0 : index
    %42 = vector.load %arg6[%c0_18, %c0_19] : memref<128x128xbf16, #tpu.memory_space<vmem>>, vector<128x128xbf16>
    %cst_20 = arith.constant dense<0.000000e+00> : vector<2x128xf32>
    %43 = tpu.matmul %41, %42, %cst_20 {dimension_numbers = #tpu.dot_dimension_numbers<[1], [0], [0], [1], [0, 0, 1, 1], [], []>} : vector<2x128xbf16>, vector<128x128xbf16>, vector<2x128xf32> -> vector<2x128xf32>
    %c0_21 = arith.constant 0 : index
    %c0_22 = arith.constant 0 : index
    %44 = vector.load %arg7[%c0_21, %c0_22] : memref<1x128xf32, #tpu.memory_space<vmem>>, vector<1x128xf32>
    %45 = vector.broadcast %44 : vector<1x128xf32> to vector<2x128xf32>
    %46 = arith.addf %43, %45 : vector<2x128xf32>
    %c0_23 = arith.constant 0 : index
    %c0_24 = arith.constant 0 : index
    %47 = vector.load %arg8[%c0_23, %c0_24] : memref<2x128xf32, #tpu.memory_space<vmem>>, vector<2x128xf32>
    tpu.vector_store %arg8[%c0_23, %c0_24], %46 {strides = array<i32>} : memref<2x128xf32, #tpu.memory_space<vmem>>, vector<2x128xf32>,
    return
  }
  func.func @transform_0(%arg0: i32) -> (i32, i32) {
    %c0_i32 = arith.constant 0 : i32
    %c0_i32_0 = arith.constant 0 : i32
    return %arg0, %c0_i32 : i32, i32
  }
  func.func @transform_1(%arg0: i32) -> (i32, i32) {
    %c0_i32 = arith.constant 0 : i32
    %c0_i32_0 = arith.constant 0 : i32
    %c0_i32_1 = arith.constant 0 : i32
    return %c0_i32, %c0_i32_0 : i32, i32
  }
  func.func @transform_2(%arg0: i32) -> (i32, i32) {
    %c0_i32 = arith.constant 0 : i32
    %c0_i32_0 = arith.constant 0 : i32
    %c0_i32_1 = arith.constant 0 : i32
    return %c0_i32, %c0_i32_0 : i32, i32
  }
  func.func @transform_3(%arg0: i32) -> (i32, i32) {
    %c0_i32 = arith.constant 0 : i32
    %c0_i32_0 = arith.constant 0 : i32
    %c0_i32_1 = arith.constant 0 : i32
    return %c0_i32, %c0_i32_0 : i32, i32
  }
  func.func @transform_4(%arg0: i32) -> (i32, i32) {
    %c0_i32 = arith.constant 0 : i32
    %c0_i32_0 = arith.constant 0 : i32
    %c0_i32_1 = arith.constant 0 : i32
    return %c0_i32, %c0_i32_0 : i32, i32
  }
  func.func @transform_5(%arg0: i32) -> (i32, i32) {
    %c0_i32 = arith.constant 0 : i32
    %c0_i32_0 = arith.constant 0 : i32
    %c0_i32_1 = arith.constant 0 : i32
    return %c0_i32, %c0_i32_0 : i32, i32
  }
  func.func @transform_6(%arg0: i32) -> (i32, i32) {
    %c0_i32 = arith.constant 0 : i32
    %c0_i32_0 = arith.constant 0 : i32
    %c0_i32_1 = arith.constant 0 : i32
    return %c0_i32, %c0_i32_0 : i32, i32
  }
  func.func @transform_7(%arg0: i32) -> (i32, i32) {
    %c0_i32 = arith.constant 0 : i32
    %c0_i32_0 = arith.constant 0 : i32
    return %arg0, %c0_i32 : i32, i32
  }
}

</mosaic_0001>

<bundles_post_ra>
// kernel: forward.1
= control target key start
LH: loop header
LB: loop body
LE: loop exit
PB: predicated region body
PF: predicated region fallthrough
CT: control target
= control target key end

     0   :  { %12 = vsyncpa [#allocation3], 0  ;;  %s1969_s0 = inlined_call_operand.vmem [shape: f32[2,784], index: 0, kind: input, shape index: {}]   ;;  %s1970_s1 = inlined_call_operand.vmem [shape: bf16[112,128], index: 1, kind: input, shape index: {}]   ;;  %s1971_s2 = inlined_call_operand.vmem [shape: f32[1,1152], index: 2, kind: input, shape index: {}]   ;;  %s1972_s3 = inlined_call_operand.hbm [shape: bf16[1152,128], index: 3, kind: input, shape index: {}]   ;;  %s1973_s4 = inlined_call_operand.vmem [shape: f32[1,128], index: 4, kind: input, shape index: {}]   ;;  %s1974_s5 = inlined_call_operand.vmem [shape: bf16[128,128], index: 5, kind: input, shape index: {}]   ;;  %s1975_s6 = inlined_call_operand.vmem [shape: f32[1,128], index: 6, kind: input, shape index: {}]   ;;  %s1976_s7 = inlined_call_operand.hbm [shape: f32[2,128], index: 7, kind: output, shape index: {}]  }
   0x1   :  { %13 = vsyncpa [#allocation4], 0  ;;  %s24_s26 = sshll.u32 %s1972_s3, 4  ;;  %s1737_s27 = smov [#allocation2]   ;;  %s25_s26 = int_to_ptr.hbm [resolvable:$true] %s24_s26 }
   0x2   :  { %s26_s28 = sshll.u32 %s1737_s27, 4  ;;  %s1738_s29 = smov 64   ;;  %s27_s28 = int_to_ptr.vmem [resolvable:$true] %s26_s28 }
   0x3   :  { %s1739_s30 = smov 4  }
   0x4   :  { %32 = dma.hbm_to_vmem [thread:$0]  %s25_s26, 9216, %s27_s28, [#allocation3], %s1738_s29, %s1738_s29, %s1739_s30  }
   0x5   :  { %1733 = dma.done.wait [#allocation3], 9216  }
   0x6   :  { %1734 = vsyncadd [#allocation3], 4294958080  ;;  %v1794_v0 = vld [vmem:[%s1969_s0] sm:$0xff]  ;;  %v1799_v1 = vld [vmem:[%s1969_s0 + $0x8] sm:$0x3f]  ;;  %s1740_s3 = smov 44  }
   0x7   :  { %121 = vst [vmem:[#allocation1] ss:$4 sm:$0xff] %v1794_v0  ;;  %s1741_s0 = smov 88   ;;  %s1742_s12 = smov 48   ;;  %v1811_v16 = vld [vmem:[%s1970_s1 + $0x30] sm:$0xff]  ;;  %v1817_v17 = vld [vmem:[%s1970_s1 + $0x28] sm:$0xff]  ;;  %v60_v35 = vpack.c.bf16 %v1794_v0, %v1794_v0 }
   0x8   :  { %236 = vst [vmem:[#allocation1 + $0x20] ss:$4 sm:$0xff] %v1799_v1  ;;  %140 = vmatpush.bf16.msra.mxu3 %v1811_v16  ;;  %108 = vmatpush.bf16.msra.mxu0 %v1811_v16  ;;  %v1827_v20 = vld [vmem:[%s1970_s1 + $0x20] sm:$0xff]  ;;  %s1743_s19 = smov 92   ;;  %v1836_v21 = vld [vmem:[%s1970_s1 + $0x18] sm:$0xff]  ;;  %v1846_v25 = vld [vmem:[%s1970_s1 + $0x10] sm:$0xff] }
   0x9   :  { %167 = vmatpush.bf16.msra.mxu2 %v1811_v16  ;;  %251 = vmatpush.bf16.msra.mxu1 %v1811_v16  ;;  %s1744_s24 = smov 8   ;;  %v1855_v26 = vld [vmem:[%s1970_s1 + $0x8] sm:$0xff]  ;;  %v1865_v31 = vld [vmem:[%s1970_s1] sm:$0xff]  ;;  %s1745_s29 = smov 52   ;;  %vm103_vm0 = vcmask 916480   ;;  %vm213_vm1 = vcmask 392192  }
   0xa   :  { %s1746_s1 = smov 96   ;;  %vm134_vm2 = vcmask 359424   ;;  %vm159_vm3 = vcmask 719872   ;;  %vm186_vm4 = vcmask 31744   ;;  %vm272_vm5 = vcmask 64512   ;;  %v1568_v59 = vld [vmem:[#allocation2 + $0x38] sm:$0xff] }
   0xb   :  { %v1576_v60 = vld [vmem:[#allocation2 + $0x78] sm:$0xff]  ;;  %vm243_vm6 = vcmask 752640   ;;  %v1567_v62 = vld [vmem:[#allocation2 + $0x30] sm:$0xff]  ;;  %vm305_vm7 = vcmask 424960   ;;  %vm330_vm8 = vcmask 785408   ;;  %s1747_s26 = smov [#allocation5]  }
   0xc   :  { %141 = vmatpush.bf16.msra.mxu3 %v1817_v17  ;;  %109 = vmatpush.bf16.msra.mxu0 %v1817_v17  ;;  %v1584_v63 = vld [vmem:[#allocation2 + $0xb8] sm:$0xff]  ;;  %s1185_s27 = sshll.u32 %s1747_s26, 4  ;;  %s1186_s27 = int_to_ptr.vmem [resolvable:$true] %s1185_s27 }
   0xd   :  { %168 = vmatpush.bf16.msra.mxu2 %v1817_v17  ;;  %252 = vmatpush.bf16.msra.mxu1 %v1817_v17 }
   0xe   :  { %v122_v2 = vld.sshfl [vmem:[#allocation1] sm:$0xff pattern:$0x73625140]  ;;  %v123_v3 = vld.sshfl [vmem:[#allocation1 + $0x8] sm:$0xff pattern:$0x73625140] }
   0xf   :  { %v126_v4 = vpack.c.bf16 %v122_v2, %v122_v2  ;;  %152 = vst [vmem:[#allocation1] ss:$4 sm:$0xff] %v1794_v0  ;;  %v238_v5 = vld.sshfl [vmem:[#allocation1 + $0x20] sm:$0xff pattern:$0x73625140]  ;;  %v127_v6 = vpack.c.bf16 %v123_v3, %v123_v3  ;;  %v1575_v2 = vld [vmem:[#allocation2 + $0x70] sm:$0xff] }
  0x10   :  { %265 = vst [vmem:[#allocation1 + $0x20] ss:$4 sm:$0xff] %v1799_v1  ;;  %142 = vmatpush.bf16.msra.mxu3 %v1827_v20  ;;  %110 = vmatpush.bf16.msra.mxu0 %v1827_v20 }
  0x11   :  { %130 = vrot.lane.b32.xlu0 %v126_v4, %s1740_s3  ;;  %169 = vmatpush.bf16.msra.mxu2 %v1827_v20  ;;  %v1592_v4 = vld [vmem:[#allocation2 + $0xf8] sm:$0xff] }
  0x12   :  { %253 = vmatpush.bf16.msra.mxu1 %v1827_v20 }
  0x14   :  { %143 = vmatpush.bf16.msra.mxu3 %v1836_v21  ;;  %111 = vmatpush.bf16.msra.mxu0 %v1836_v21 }
  0x15   :  { %170 = vmatpush.bf16.msra.mxu2 %v1836_v21 }
  0x16   :  { %v153_v7 = vld.sshfl [vmem:[#allocation1 + $0x8] sm:$0xff pattern:$0x73625140]  ;;  %v154_v8 = vld.sshfl [vmem:[#allocation1 + $0x10] sm:$0xff pattern:$0x73625140]  ;;  %254 = vmatpush.bf16.msra.mxu1 %v1836_v21 }
  0x17   :  { %v1652_v9 = vpack.i.bf16 %v154_v8, %v153_v7  ;;  %179 = vst [vmem:[#allocation1] ss:$4 sm:$0xff] %v1794_v0  ;;  %v267_v22 = vld.sshfl [vmem:[#allocation1 + $0x20] sm:$0xff pattern:$0x73625140]  ;;  %v1583_v7 = vld [vmem:[#allocation2 + $0xb0] sm:$0xff] }
  0x18   :  { %144 = vmatpush.bf16.msra.mxu3 %v1846_v25  ;;  %112 = vmatpush.bf16.msra.mxu0 %v1846_v25  ;;  %v1574_v8 = vld [vmem:[#allocation2 + $0x68] sm:$0xff] }
  0x19   :  { %132 = vrot.lane.b32.xlu0 %v127_v6, %s1740_s3  ;;  %1653 = vrot.lane.b32.xlu1 %v1652_v9, %s1741_s0  ;;  %v1566_v6 = vld [vmem:[#allocation2 + $0x28] sm:$0xff]  ;;  %v1591_v9 = vld [vmem:[#allocation2 + $0xf0] sm:$0xff] }
  0x1a   :  { %171 = vmatpush.bf16.msra.mxu2 %v1846_v25  ;;  %255 = vmatpush.bf16.msra.mxu1 %v1846_v25 }
  0x1c   :  { %145 = vmatpush.bf16.msra.mxu3 %v1855_v26  ;;  %113 = vmatpush.bf16.msra.mxu0 %v1855_v26 }
  0x1e   :  { %v180_v10 = vld.sshfl [vmem:[#allocation1 + $0x8] sm:$0xff pattern:$0x73625140]  ;;  %v181_v11 = vld.sshfl [vmem:[#allocation1 + $0x10] sm:$0xff pattern:$0x73625140]  ;;  %172 = vmatpush.bf16.msra.mxu2 %v1855_v26  ;;  %256 = vmatpush.bf16.msra.mxu1 %v1855_v26 }
  0x1f   :  { %v1657_v12 = vpack.i.bf16 %v181_v11, %v180_v10  ;;  %206 = vst [vmem:[#allocation1] ss:$4 sm:$0xff] %v1794_v0  ;;  %v1565_v10 = vld [vmem:[#allocation2 + $0x20] sm:$0xff]  ;;  %v1582_v11 = vld [vmem:[#allocation2 + $0xa8] sm:$0xff] }
  0x20   :  { %146 = vmatpush.bf16.msra.mxu3 %v1865_v31  ;;  %114 = vmatpush.bf16.msra.mxu0 %v1865_v31 }
  0x21   :  { %1658 = vrot.lane.b32.xlu1 %v1657_v12, %s1739_s30  ;;  %v1573_v12 = vld [vmem:[#allocation2 + $0x60] sm:$0xff] }
  0x22   :  { %173 = vmatpush.bf16.msra.mxu2 %v1865_v31  ;;  %257 = vmatpush.bf16.msra.mxu1 %v1865_v31 }
  0x23   :  { %1225 = vmatmul.msk.bf16.vlgmr.msra.gmra.mxu0 %vm103_vm0, %v60_v35  ;;  %v1599_v35 = vld [vmem:[#allocation2 + $0x130] sm:$0xff] }
  0x24   :  { %194 = vmatpush.bf16.msrb.mxu3 %v1811_v16  ;;  %221 = vmatpush.bf16.msrb.mxu0 %v1811_v16 }
  0x26   :  { %v207_v13 = vld.sshfl [vmem:[#allocation1 + $0x10] sm:$0xff pattern:$0x73625140]  ;;  %v208_v14 = vld.sshfl [vmem:[#allocation1 + $0x18] sm:$0xff pattern:$0x73625140]  ;;  %280 = vmatpush.bf16.msrb.mxu2 %v1811_v16  ;;  %979 = vmatpush.bf16.msrb.mxu1 %v1568_v59 }
  0x27   :  { %234 = vst [vmem:[#allocation1] ss:$4 sm:$0xff] %v1794_v0  ;;  %v1662_v15 = vpack.i.bf16 %v208_v14, %v207_v13  ;;  %v1590_v13 = vld [vmem:[#allocation2 + $0xe8] sm:$0xff]  ;;  %v1564_v14 = vld [vmem:[#allocation2 + $0x18] sm:$0xff]  ;;  %v1613_v59 = vld [vmem:[#allocation2 + $0x1a0] sm:$0xff] }
  0x28   :  { %195 = vmatpush.bf16.msrb.mxu3 %v1817_v17  ;;  %222 = vmatpush.bf16.msrb.mxu0 %v1817_v17 }
  0x29   :  { %1663 = vrot.lane.b32.xlu2 %v1662_v15, %s1742_s12  ;;  %v1581_v15 = vld [vmem:[#allocation2 + $0xa0] sm:$0xff] }
  0x2a   :  { %281 = vmatpush.bf16.msrb.mxu2 %v1817_v17  ;;  %980 = vmatpush.bf16.msrb.mxu1 %v1567_v62  ;;  %v1585_v62 = vld [vmem:[#allocation2 + $0xc0] sm:$0xff] }
  0x2c   :  { %196 = vmatpush.bf16.msrb.mxu3 %v1827_v20  ;;  %223 = vmatpush.bf16.msrb.mxu0 %v1827_v20 }
  0x2e   :  { %v237_v18 = vld.sshfl [vmem:[#allocation1 + $0x18] sm:$0xff pattern:$0x73625140]  ;;  %282 = vmatpush.bf16.msrb.mxu2 %v1827_v20  ;;  %981 = vmatpush.bf16.msrb.mxu1 %v1566_v6  ;;  %v1602_v6 = vld [vmem:[#allocation2 + $0x148] sm:$0xff] }
  0x2f   :  { %v1672_v19 = vpack.i.bf16 %v238_v5, %v237_v18  ;;  %263 = vst [vmem:[#allocation1] ss:$4 sm:$0xff] %v1794_v0 }
  0x30   :  { %197 = vmatpush.bf16.msrb.mxu3 %v1836_v21  ;;  %224 = vmatpush.bf16.msrb.mxu0 %v1836_v21 }
  0x31   :  { %1673 = vrot.lane.b32.xlu0 %v1672_v19, %s1743_s19  ;;  %v1563_v19 = vld [vmem:[#allocation2 + $0x10] sm:$0xff] }
  0x32   :  { %283 = vmatpush.bf16.msrb.mxu2 %v1836_v21  ;;  %982 = vmatpush.bf16.msrb.mxu1 %v1565_v10  ;;  %v1622_v10 = vld [vmem:[#allocation2 + $0x1e8] sm:$0xff] }
  0x34   :  { %198 = vmatpush.bf16.msrb.mxu3 %v1846_v25  ;;  %225 = vmatpush.bf16.msrb.mxu0 %v1846_v25 }
  0x36   :  { %v266_v23 = vld.sshfl [vmem:[#allocation1 + $0x18] sm:$0xff pattern:$0x73625140]  ;;  %284 = vmatpush.bf16.msrb.mxu2 %v1846_v25  ;;  %983 = vmatpush.bf16.msrb.mxu1 %v1564_v14 }
  0x37   :  { %292 = vst [vmem:[#allocation1] ss:$4 sm:$0xff] %v1799_v1  ;;  %v1667_v24 = vpack.i.bf16 %v267_v22, %v266_v23  ;;  %v1571_v22 = vld [vmem:[#allocation2 + $0x50] sm:$0xff]  ;;  %v1562_v23 = vld [vmem:[#allocation2 + $0x8] sm:$0xff] }
  0x38   :  { %199 = vmatpush.bf16.msrb.mxu3 %v1855_v26  ;;  %226 = vmatpush.bf16.msrb.mxu0 %v1855_v26 }
  0x39   :  { %1668 = vrot.lane.b32.xlu2 %v1667_v24, %s1744_s24  ;;  %v1579_v24 = vld [vmem:[#allocation2 + $0x90] sm:$0xff] }
  0x3a   :  { %285 = vmatpush.bf16.msrb.mxu2 %v1855_v26  ;;  %984 = vmatpush.bf16.msrb.mxu1 %v1563_v19 }
  0x3c   :  { %200 = vmatpush.bf16.msrb.mxu3 %v1865_v31  ;;  %227 = vmatpush.bf16.msrb.mxu0 %v1865_v31 }
  0x3e   :  { %v293_v27 = vld.sshfl [vmem:[#allocation1] sm:$0xff pattern:$0x73625140]  ;;  %v294_v28 = vld.sshfl [vmem:[#allocation1 + $0x8] sm:$0xff pattern:$0x73625140]  ;;  %286 = vmatpush.bf16.msrb.mxu2 %v1865_v31  ;;  %985 = vmatpush.bf16.msrb.mxu1 %v1562_v23 }
  0x3f   :  { %v297_v29 = vpack.c.bf16 %v293_v27, %v293_v27  ;;  %323 = vst [vmem:[#allocation1] ss:$4 sm:$0xff] %v1799_v1  ;;  %v298_v30 = vpack.c.bf16 %v294_v28, %v294_v28  ;;  %v1561_v27 = vld [vmem:[#allocation2] sm:$0xff]  ;;  %v1578_v28 = vld [vmem:[#allocation2 + $0x88] sm:$0xff] }
  0x40   :  { %338 = vmatpush.bf16.msra.mxu0 %v1811_v16 }
  0x41   :  { %301 = vrot.lane.b32.xlu1 %v297_v29, %s1745_s29  ;;  %303 = vrot.lane.b32.xlu2 %v298_v30, %s1745_s29 }
  0x42   :  { %986 = vmatpush.bf16.msrb.mxu1 %v1561_v27  ;;  %v1628_v27 = vld [vmem:[#allocation2 + $0x218] sm:$0xff] }
  0x44   :  { %339 = vmatpush.bf16.msra.mxu0 %v1817_v17 }
  0x46   :  { %v324_v32 = vld.sshfl [vmem:[#allocation1 + $0x8] sm:$0xff pattern:$0x73625140]  ;;  %v325_v33 = vld.sshfl [vmem:[#allocation1 + $0x10] sm:$0xff pattern:$0x73625140] }
  0x47   :  { %v1677_v34 = vpack.i.bf16 %v325_v33, %v324_v32  ;;  %v1569_v32 = vld [vmem:[#allocation2 + $0x40] sm:$0xff] }
  0x48   :  { %340 = vmatpush.bf16.msra.mxu0 %v1827_v20 }
  0x49   :  { %1678 = vrot.lane.b32.xlu0 %v1677_v34, %s1746_s1  ;;  %s1187_s1 = sshll.u32 %s1976_s7, 4  ;;  %s1188_s1 = int_to_ptr.hbm [resolvable:$true] %s1187_s1 }
  0x4c   :  { %341 = vmatpush.bf16.msra.mxu0 %v1836_v21 }
  0x50   :  { %342 = vmatpush.bf16.msra.mxu0 %v1846_v25 }
  0x54   :  { %343 = vmatpush.bf16.msra.mxu0 %v1855_v26 }
  0x58   :  { %344 = vmatpush.bf16.msra.mxu0 %v1865_v31 }
  0x83   :  { %v131_v36 = vpop.permute.xlu0 %130  ;;  %v1664_v37 = vpop.permute.xlu2 %1663 }
  0x84   :  { %v1666_v38 = vunpack.i.h.bf16 %v1664_v37  ;;  %v1665_v39 = vunpack.i.l.bf16 %v1664_v37  ;;  %v1608_v37 = vld [vmem:[#allocation2 + $0x178] sm:$0xff] }
  0x86   :  { %v214_v40 = vsel %vm213_vm1, %v1665_v39, %v1666_v38  ;;  %v1577_v38 = vld [vmem:[#allocation2 + $0x80] sm:$0xff] }
  0x87   :  { %v216_v41 = vpack.c.bf16 %v214_v40, %v214_v40  ;;  %v1589_v39 = vld [vmem:[#allocation2 + $0xe0] sm:$0xff]  ;;  %v1923_v40 = vld [vmem:[%s1971_s2] sm:$0xff] }
  0x88   :  { %v355_v19 = vperm.slane %v1923_v40, 1 }
  0x89   :  { %1229 = vmatmul.msk.bf16.vlgmr.msrb.gmra.mxu0 %vm103_vm0, %v216_v41  ;;  %v354_v41 = vperm.slane %v1923_v40, 0 }
  0x8a   :  { %1018 = vmatpush.bf16.msrb.mxu0 %v1592_v4  ;;  %v1623_v4 = vld [vmem:[#allocation2 + $0x1f0] sm:$0xff] }
  0x8b   :  { %v133_v42 = vpop.permute.xlu0 %132  ;;  %v1654_v43 = vpop.permute.xlu1 %1653 }
  0x8c   :  { %v1656_v44 = vunpack.i.h.bf16 %v1654_v43  ;;  %v1655_v45 = vunpack.i.l.bf16 %v1654_v43  ;;  %v135_v46 = vsel %vm134_vm2, %v131_v36, %v133_v42  ;;  %v1598_v36 = vld [vmem:[#allocation2 + $0x128] sm:$0xff] }
  0x8d   :  { %1226 = vmatmul.msk.bf16.vlgmr.msra.gmra.mxu3 %vm103_vm0, %v135_v46  ;;  %v1597_v46 = vld [vmem:[#allocation2 + $0x120] sm:$0xff] }
  0x8e   :  { %v160_v47 = vsel %vm159_vm3, %v1655_v45, %v1656_v44  ;;  %311 = vmatpush.bf16.msra.mxu3 %v1811_v16  ;;  %1019 = vmatpush.bf16.msrb.mxu0 %v1591_v9  ;;  %v1572_v16 = vld [vmem:[#allocation2 + $0x58] sm:$0xff]  ;;  %v1610_v9 = vld [vmem:[#allocation2 + $0x188] sm:$0xff] }
  0x8f   :  { %v162_v48 = vpack.c.bf16 %v160_v47, %v160_v47  ;;  %v1616_v44 = vld [vmem:[#allocation2 + $0x1b8] sm:$0xff]  ;;  %v1607_v47 = vld [vmem:[#allocation2 + $0x170] sm:$0xff] }
  0x91   :  { %1227 = vmatmul.msk.bf16.vlgmr.msra.gmra.mxu2 %vm103_vm0, %v162_v48 }
  0x92   :  { %312 = vmatpush.bf16.msra.mxu3 %v1817_v17  ;;  %992 = vmatpush.bf16.msra.mxu2 %v1576_v60  ;;  %v1594_v60 = vld [vmem:[#allocation2 + $0x108] sm:$0xff] }
  0x93   :  { %v1659_v49 = vpop.permute.xlu1 %1658  ;;  %v1669_v50 = vpop.permute.xlu2 %1668  ;;  %1020 = vmatpush.bf16.msrb.mxu0 %v1590_v13  ;;  %v1631_v13 = vld [vmem:[#allocation2 + $0x230] sm:$0xff] }
  0x94   :  { %v1661_v51 = vunpack.i.h.bf16 %v1659_v49  ;;  %v1660_v52 = vunpack.i.l.bf16 %v1659_v49  ;;  %v1671_v54 = vunpack.i.h.bf16 %v1669_v50  ;;  %v1670_v55 = vunpack.i.l.bf16 %v1669_v50  ;;  %v1588_v49 = vld [vmem:[#allocation2 + $0xd8] sm:$0xff]  ;;  %v1615_v50 = vld [vmem:[#allocation2 + $0x1b0] sm:$0xff] }
  0x96   :  { %v187_v53 = vsel %vm186_vm4, %v1660_v52, %v1661_v51  ;;  %313 = vmatpush.bf16.msra.mxu3 %v1827_v20  ;;  %v273_v57 = vsel %vm272_vm5, %v1670_v55, %v1671_v54  ;;  %993 = vmatpush.bf16.msra.mxu2 %v1575_v2  ;;  %v1580_v20 = vld [vmem:[#allocation2 + $0x98] sm:$0xff]  ;;  %v1587_v54 = vld [vmem:[#allocation2 + $0xd0] sm:$0xff]  ;;  %v1614_v55 = vld [vmem:[#allocation2 + $0x1a8] sm:$0xff] }
  0x97   :  { %v189_v56 = vpack.c.bf16 %v187_v53, %v187_v53  ;;  %v275_v58 = vpack.c.bf16 %v273_v57, %v273_v57  ;;  %1021 = vmatpush.bf16.msrb.mxu0 %v1589_v39  ;;  %v1596_v52 = vld [vmem:[#allocation2 + $0x118] sm:$0xff]  ;;  %v1606_v53 = vld [vmem:[#allocation2 + $0x168] sm:$0xff]  ;;  %v1605_v57 = vld [vmem:[#allocation2 + $0x160] sm:$0xff] }
  0x98   :  { %v1603_v2 = vld [vmem:[#allocation2 + $0x150] sm:$0xff]  ;;  %v1626_v39 = vld [vmem:[#allocation2 + $0x208] sm:$0xff] }
  0x9a   :  { %314 = vmatpush.bf16.msra.mxu3 %v1836_v21  ;;  %994 = vmatpush.bf16.msra.mxu2 %v1574_v8 }
  0x9b   :  { %v304_v17 = vpop.permute.xlu2 %303  ;;  %1022 = vmatpush.bf16.msrb.mxu0 %v1588_v49 }
  0x9d   :  { %1228 = vmatmul.msk.bf16.vlgmr.msrb.gmra.mxu3 %vm103_vm0, %v189_v56  ;;  %v1595_v56 = vld [vmem:[#allocation2 + $0x110] sm:$0xff] }
  0x9e   :  { %315 = vmatpush.bf16.msra.mxu3 %v1846_v25  ;;  %995 = vmatpush.bf16.msra.mxu2 %v1573_v12  ;;  %v1570_v25 = vld [vmem:[#allocation2 + $0x48] sm:$0xff]  ;;  %v1601_v12 = vld [vmem:[#allocation2 + $0x140] sm:$0xff] }
  0x9f   :  { %1023 = vmatpush.bf16.msrb.mxu0 %v1587_v54 }
  0xa0   :  { %v116_v42 = vpop.f32.mrf.mxu0 }
  0xa1   :  { %1231 = vmatmul.msk.bf16.vlgmr.msrb.gmra.mxu2 %vm103_vm0, %v275_v58  ;;  %v372_v43 = vadd.f32 %v354_v41, %v116_v42  ;;  %v1586_v58 = vld [vmem:[#allocation2 + $0xc8] sm:$0xff]  ;;  %v357_v41 = vperm.slane %v1923_v40, 3 }
  0xa2   :  { %316 = vmatpush.bf16.msra.mxu3 %v1855_v26  ;;  %996 = vmatpush.bf16.msra.mxu2 %v1572_v16  ;;  %v1621_v16 = vld [vmem:[#allocation2 + $0x1e0] sm:$0xff] }
  0xa3   :  { %v1674_v61 = vpop.permute.xlu0 %1673  ;;  %v381_v45 = vmul.f32 %v372_v43, %v372_v43  ;;  %1024 = vmatpush.bf16.msrb.mxu0 %v1586_v58  ;;  %v1625_v43 = vld [vmem:[#allocation2 + $0x200] sm:$0xff] }
  0xa4   :  { %v1676_v0 = vunpack.i.h.bf16 %v1674_v61  ;;  %v1675_v1 = vunpack.i.l.bf16 %v1674_v61  ;;  %v1604_v61 = vld [vmem:[#allocation2 + $0x158] sm:$0xff] }
  0xa5   :  { %v390_v48 = vpack.c.bf16 %v381_v45, %v381_v45  ;;  %v360_v45 = vperm.slane %v1923_v40, 6 }
  0xa6   :  { %v244_v3 = vsel %vm243_vm6, %v1675_v1, %v1676_v0  ;;  %317 = vmatpush.bf16.msra.mxu3 %v1865_v31  ;;  %997 = vmatpush.bf16.msra.mxu2 %v1571_v22  ;;  %v1600_v31 = vld [vmem:[#allocation2 + $0x138] sm:$0xff]  ;;  %v1593_v1 = vld [vmem:[#allocation2 + $0x100] sm:$0xff] }
  0xa7   :  { %v246_v5 = vpack.c.bf16 %v244_v3, %v244_v3  ;;  %v1624_v0 = vld [vmem:[#allocation2 + $0x1f8] sm:$0xff]  ;;  %1025 = vmatpush.bf16.msrb.mxu0 %v1585_v62  ;;  %v1611_v3 = vld [vmem:[#allocation2 + $0x190] sm:$0xff]  ;;  %v1629_v22 = vld [vmem:[#allocation2 + $0x220] sm:$0xff] }
  0xa8   :  { %v118_v51 = vpop.f32.mrf.mxu0 }
  0xa9   :  { %1230 = vmatmul.msk.bf16.vlgmr.msra.gmra.mxu1 %vm103_vm0, %v246_v5  ;;  %v358_v5 = vperm.slane %v1923_v40, 4 }
  0xaa   :  { %1005 = vmatpush.bf16.msrb.mxu3 %v1584_v63  ;;  %998 = vmatpush.bf16.msra.mxu2 %v1570_v25  ;;  %v1612_v63 = vld [vmem:[#allocation2 + $0x198] sm:$0xff] }
  0xab   :  { %1031 = vmatpush.bf16.msra.mxu1 %v1600_v31 }
  0xae   :  { %1006 = vmatpush.bf16.msrb.mxu3 %v1583_v7  ;;  %999 = vmatpush.bf16.msra.mxu2 %v1569_v32  ;;  %v1632_v7 = vld [vmem:[#allocation2 + $0x238] sm:$0xff]  ;;  %v1618_v32 = vld [vmem:[#allocation2 + $0x1c8] sm:$0xff] }
  0xaf   :  { %1032 = vmatpush.bf16.msra.mxu1 %v1599_v35  ;;  %v1627_v35 = vld [vmem:[#allocation2 + $0x210] sm:$0xff] }
  0xb2   :  { %1007 = vmatpush.bf16.msrb.mxu3 %v1582_v11  ;;  %1044 = vmatpush.bf16.msrb.mxu2 %v1608_v37  ;;  %v1617_v37 = vld [vmem:[#allocation2 + $0x1c0] sm:$0xff] }
  0xb3   :  { %v302_v18 = vpop.permute.xlu1 %301  ;;  %1033 = vmatpush.bf16.msra.mxu1 %v1598_v36 }
  0xb4   :  { %v306_v21 = vsel %vm305_vm7, %v302_v18, %v304_v17  ;;  %v1630_v18 = vld [vmem:[#allocation2 + $0x228] sm:$0xff] }
  0xb5   :  { %1232 = vmatmul.msk.bf16.vlgmr.msra.gmra.mxu3 %vm103_vm0, %v306_v21 }
  0xb6   :  { %1008 = vmatpush.bf16.msrb.mxu3 %v1581_v15  ;;  %1045 = vmatpush.bf16.msrb.mxu2 %v1607_v47  ;;  %v1609_v15 = vld [vmem:[#allocation2 + $0x180] sm:$0xff]  ;;  %v359_v47 = vperm.slane %v1923_v40, 5 }
  0xb7   :  { %1034 = vmatpush.bf16.msra.mxu1 %v1597_v46 }
  0xb9   :  { %987 = vmatmul.bf16.vlgmr.msrb.gmra.mxu1 %v390_v48 }
  0xba   :  { %1009 = vmatpush.bf16.msrb.mxu3 %v1580_v20  ;;  %1046 = vmatpush.bf16.msrb.mxu2 %v1606_v53  ;;  %v1620_v20 = vld [vmem:[#allocation2 + $0x1d8] sm:$0xff] }
  0xbb   :  { %v1679_v26 = vpop.permute.xlu0 %1678  ;;  %1035 = vmatpush.bf16.msra.mxu1 %v1596_v52 }
  0xbc   :  { %v1681_v29 = vunpack.i.h.bf16 %v1679_v26  ;;  %v1680_v30 = vunpack.i.l.bf16 %v1679_v26  ;;  %v356_v26 = vperm.slane %v1923_v40, 2 }
  0xbe   :  { %1010 = vmatpush.bf16.msrb.mxu3 %v1579_v24  ;;  %v331_v33 = vsel %vm330_vm8, %v1680_v30, %v1681_v29  ;;  %1047 = vmatpush.bf16.msrb.mxu2 %v1605_v57  ;;  %v1619_v24 = vld [vmem:[#allocation2 + $0x1d0] sm:$0xff] }
  0xbf   :  { %v333_v34 = vpack.c.bf16 %v331_v33, %v331_v33  ;;  %1036 = vmatpush.bf16.msra.mxu1 %v1595_v56 }
  0xc1   :  { %1233 = vmatmul.msk.bf16.vlgmr.msra.gmra.mxu0 %vm103_vm0, %v333_v34 }
  0xc2   :  { %1011 = vmatpush.bf16.msrb.mxu3 %v1578_v28  ;;  %1048 = vmatpush.bf16.msrb.mxu2 %v1604_v61 }
  0xc3   :  { %1037 = vmatpush.bf16.msra.mxu1 %v1594_v60  ;;  %1070 = vmatpush.bf16.msra.mxu0 %v1624_v0  ;;  %v361_v60 = vperm.slane %v1923_v40, 7  ;;  %v1682_v0 = vld [vmem:[%s1971_s2 + $0x8] ss:$0 sm:$0xff]  ;;  %v1640_v40 = vld [vmem:[%s1974_s5 + $0x38] sm:$0xff] }
  0xc6   :  { %1012 = vmatpush.bf16.msrb.mxu3 %v1577_v38  ;;  %1049 = vmatpush.bf16.msrb.mxu2 %v1603_v2 }
  0xc7   :  { %1038 = vmatpush.bf16.msra.mxu1 %v1593_v1  ;;  %1071 = vmatpush.bf16.msra.mxu0 %v1623_v4 }
  0xca   :  { %1057 = vmatpush.bf16.msra.mxu3 %v1616_v44  ;;  %1050 = vmatpush.bf16.msrb.mxu2 %v1602_v6 }
  0xcb   :  { %1083 = vmatpush.bf16.msrb.mxu1 %v1632_v7  ;;  %1072 = vmatpush.bf16.msra.mxu0 %v1622_v10  ;;  %v1639_v10 = vld [vmem:[%s1974_s5 + $0x30] sm:$0xff] }
  0xce   :  { %1058 = vmatpush.bf16.msra.mxu3 %v1615_v50  ;;  %1051 = vmatpush.bf16.msrb.mxu2 %v1601_v12  ;;  %v1638_v12 = vld [vmem:[%s1974_s5 + $0x28] sm:$0xff] }
  0xcf   :  { %1084 = vmatpush.bf16.msrb.mxu1 %v1631_v13  ;;  %1073 = vmatpush.bf16.msra.mxu0 %v1621_v16 }
  0xd2   :  { %1059 = vmatpush.bf16.msra.mxu3 %v1614_v55 }
  0xd3   :  { %1085 = vmatpush.bf16.msrb.mxu1 %v1630_v18  ;;  %1074 = vmatpush.bf16.msra.mxu0 %v1620_v20 }
  0xd6   :  { %1060 = vmatpush.bf16.msra.mxu3 %v1613_v59 }
  0xd7   :  { %1086 = vmatpush.bf16.msrb.mxu1 %v1629_v22  ;;  %1075 = vmatpush.bf16.msra.mxu0 %v1619_v24  ;;  %v1633_v22 = vld [vmem:[%s1974_s5] sm:$0xff] }
  0xd8   :  { %v1683_v24 = vld [vmem:[%s1973_s4] ss:$0 sm:$0xff] }
  0xda   :  { %1061 = vmatpush.bf16.msra.mxu3 %v1612_v63 }
  0xdb   :  { %1087 = vmatpush.bf16.msrb.mxu1 %v1628_v27  ;;  %1076 = vmatpush.bf16.msra.mxu0 %v1618_v32 }
  0xde   :  { %1062 = vmatpush.bf16.msra.mxu3 %v1611_v3 }
  0xdf   :  { %1088 = vmatpush.bf16.msrb.mxu1 %v1627_v35  ;;  %1077 = vmatpush.bf16.msra.mxu0 %v1617_v37 }
  0xe2   :  { %1063 = vmatpush.bf16.msra.mxu3 %v1610_v9 }
  0xe3   :  { %1089 = vmatpush.bf16.msrb.mxu1 %v1626_v39 }
  0xe6   :  { %1064 = vmatpush.bf16.msra.mxu3 %v1609_v15  ;;  %v1636_v15 = vld [vmem:[%s1974_s5 + $0x18] sm:$0xff] }
  0xe7   :  { %1090 = vmatpush.bf16.msrb.mxu1 %v1625_v43 }
 0x106   :  { %v229_v8 = vpop.f32.mrf.mxu0 }
 0x107   :  { %v376_v11 = vadd.f32 %v358_v5, %v229_v8 }
 0x109   :  { %v385_v14 = vmul.f32 %v376_v11, %v376_v11 }
 0x10b   :  { %v394_v17 = vpack.c.bf16 %v385_v14, %v385_v14  ;;  %v1637_v14 = vld [vmem:[%s1974_s5 + $0x20] sm:$0xff] }
 0x10d   :  { %1039 = vmatmul.bf16.vlgmr.msra.gmra.mxu1 %v394_v17  ;;  %v1635_v17 = vld [vmem:[%s1974_s5 + $0x10] sm:$0xff] }
 0x10e   :  { %v231_v21 = vpop.f32.mrf.mxu0 }
 0x110   :  { %v148_v23 = vpop.f32.mrf.mxu3 }
 0x111   :  { %v373_v25 = vadd.f32 %v355_v19, %v148_v23  ;;  %v1634_v19 = vld [vmem:[%s1974_s5 + $0x8] sm:$0xff] }
 0x113   :  { %v382_v28 = vmul.f32 %v373_v25, %v373_v25 }
 0x114   :  { %v175_v29 = vpop.f32.mrf.mxu2 }
 0x115   :  { %v391_v30 = vpack.c.bf16 %v382_v28, %v382_v28  ;;  %v374_v31 = vadd.f32 %v356_v26, %v175_v29 }
 0x117   :  { %v383_v33 = vmul.f32 %v374_v31, %v374_v31  ;;  %1000 = vmatmul.bf16.vlgmr.msra.gmra.mxu2 %v391_v30 }
 0x118   :  { %v150_v34 = vpop.f32.mrf.mxu3  ;;  %1166 = vmatpush.bf16.msra.mxu2 %v1640_v40 }
 0x119   :  { %v392_v36 = vpack.c.bf16 %v383_v33, %v383_v33 }
 0x11b   :  { %1013 = vmatmul.bf16.vlgmr.msrb.gmra.mxu3 %v392_v36 }
 0x11c   :  { %v177_v38 = vpop.f32.mrf.mxu2  ;;  %1167 = vmatpush.bf16.msra.mxu2 %v1639_v10 }
 0x120   :  { %v202_v42 = vpop.f32.mrf.mxu3  ;;  %1168 = vmatpush.bf16.msra.mxu2 %v1638_v12 }
 0x121   :  { %v375_v44 = vadd.f32 %v357_v41, %v202_v42 }
 0x123   :  { %v384_v46 = vmul.f32 %v375_v44, %v375_v44 }
 0x124   :  { %v288_v48 = vpop.f32.mrf.mxu2  ;;  %1169 = vmatpush.bf16.msra.mxu2 %v1637_v14 }
 0x125   :  { %v393_v49 = vpack.c.bf16 %v384_v46, %v384_v46  ;;  %v378_v50 = vadd.f32 %v360_v45, %v288_v48  ;;  %v1684_v46 = vld [vmem:[%s1975_s6] ss:$0 sm:$0xff] }
 0x126   :  { %v259_v51 = vpop.f32.mrf.mxu1 }
 0x127   :  { %v377_v52 = vadd.f32 %v359_v47, %v259_v51  ;;  %1026 = vmatmul.bf16.vlgmr.msrb.gmra.mxu0 %v393_v49  ;;  %v387_v53 = vmul.f32 %v378_v50, %v378_v50 }
 0x128   :  { %v204_v54 = vpop.f32.mrf.mxu3  ;;  %1170 = vmatpush.bf16.msra.mxu2 %v1636_v15 }
 0x129   :  { %v386_v55 = vmul.f32 %v377_v52, %v377_v52  ;;  %v396_v56 = vpack.c.bf16 %v387_v53, %v387_v53 }
 0x12b   :  { %v395_v57 = vpack.c.bf16 %v386_v55, %v386_v55  ;;  %1065 = vmatmul.bf16.vlgmr.msra.gmra.mxu3 %v396_v56 }
 0x12c   :  { %v290_v58 = vpop.f32.mrf.mxu2  ;;  %1171 = vmatpush.bf16.msra.mxu2 %v1635_v17 }
 0x12d   :  { %1052 = vmatmul.bf16.vlgmr.msrb.gmra.mxu2 %v395_v57 }
 0x12e   :  { %v261_v59 = vpop.f32.mrf.mxu1 }
 0x130   :  { %1172 = vmatpush.bf16.msra.mxu2 %v1634_v19 }
 0x134   :  { %1173 = vmatpush.bf16.msra.mxu2 %v1633_v22 }
 0x136   :  { %v988_v8 = vpop.f32.mrf.mxu1 }
 0x137   :  { %v989_v25 = vadd.f32 %v1683_v24, %v988_v8 }
 0x138   :  { %v319_v61 = vpop.f32.mrf.mxu3 }
 0x139   :  { %v379_v62 = vadd.f32 %v361_v60, %v319_v61 }
 0x13b   :  { %v388_v63 = vmul.f32 %v379_v62, %v379_v62 }
 0x13d   :  { %v397_v1 = vpack.c.bf16 %v388_v63, %v388_v63 }
 0x13e   :  { %v346_v2 = vpop.f32.mrf.mxu0  ;;  %v990_v9 = vpop.f32.mrf.mxu1 }
 0x13f   :  { %v380_v3 = vadd.f32 %v1682_v0, %v346_v2  ;;  %1078 = vmatmul.bf16.vlgmr.msra.gmra.mxu0 %v397_v1 }
 0x140   :  { %v321_v4 = vpop.f32.mrf.mxu3 }
 0x141   :  { %v389_v5 = vmul.f32 %v380_v3, %v380_v3 }
 0x143   :  { %v398_v6 = vpack.c.bf16 %v389_v5, %v389_v5 }
 0x145   :  { %1091 = vmatmul.bf16.vlgmr.msrb.gmra.mxu1 %v398_v6 }
 0x146   :  { %v348_v7 = vpop.f32.mrf.mxu0 }
 0x18a   :  { %v1040_v11 = vpop.f32.mrf.mxu1 }
 0x192   :  { %v1042_v13 = vpop.f32.mrf.mxu1 }
 0x19a   :  { %v1001_v16 = vpop.f32.mrf.mxu2 }
 0x19b   :  { %v1002_v28 = vadd.f32 %v1001_v16, %v989_v25 }
 0x19e   :  { %v1014_v18 = vpop.f32.mrf.mxu3 }
 0x19f   :  { %v1015_v30 = vadd.f32 %v1014_v18, %v1002_v28 }
 0x1a2   :  { %v1003_v20 = vpop.f32.mrf.mxu2 }
 0x1a4   :  { %v1027_v21 = vpop.f32.mrf.mxu0 }
 0x1a5   :  { %v1028_v31 = vadd.f32 %v1027_v21, %v1015_v30 }
 0x1a6   :  { %v1016_v23 = vpop.f32.mrf.mxu3 }
 0x1a7   :  { %v1041_v34 = vadd.f32 %v1040_v11, %v1028_v31 }
 0x1ac   :  { %v1029_v26 = vpop.f32.mrf.mxu0 }
 0x1ae   :  { %v1066_v27 = vpop.f32.mrf.mxu3 }
 0x1b0   :  { %v1053_v29 = vpop.f32.mrf.mxu2 }
 0x1b1   :  { %v1054_v35 = vadd.f32 %v1053_v29, %v1041_v34 }
 0x1b3   :  { %v1067_v37 = vadd.f32 %v1066_v27, %v1054_v35 }
 0x1b6   :  { %v1068_v32 = vpop.f32.mrf.mxu3 }
 0x1b8   :  { %v1055_v33 = vpop.f32.mrf.mxu2 }
 0x1bc   :  { %v1079_v36 = vpop.f32.mrf.mxu0 }
 0x1bd   :  { %v1080_v38 = vadd.f32 %v1079_v36, %v1067_v37 }
 0x1c2   :  { %v1092_v39 = vpop.f32.mrf.mxu1 }
 0x1c3   :  { %v1093_v41 = vadd.f32 %v1092_v39, %v1080_v38 }
 0x1c4   :  { %v1081_v42 = vpop.f32.mrf.mxu0 }
 0x1c5   :  { %v1096_v43 = vmul.f32 %v1093_v41, %v1093_v41 }
 0x1c7   :  { %v1097_v44 = vpack.c.bf16 %v1096_v43, %v1096_v43 }
 0x1c9   :  { %1174 = vmatmul.bf16.vlgmr.msra.gmra.mxu2 %v1097_v44 }
 0x1ca   :  { %v1094_v45 = vpop.f32.mrf.mxu1 }
 0x24c   :  { %v1175_v47 = vpop.f32.mrf.mxu2 }
 0x24d   :  { %v1176_v48 = vadd.f32 %v1684_v46, %v1175_v47 }
 0x24f   :  { %1179 = vst [vmem:[#allocation5] sm:$0x3] %v1176_v48 }
 0x250   :  { %1190 = dma.vmem_to_hbm [thread:$0]  %s1186_s27, 32, %s1188_s1, [#allocation4]  }
 0x254   :  { %v1177_v49 = vpop.f32.mrf.mxu2 }
 0x255   :  { %1735 = dma.done.wait [#allocation4], 32  }
 0x256   :  { %1736 = vsyncadd [#allocation4], 4294967264 }
 0x257   :  { %1195 = vsyncpa [#allocation3], 1 }
 0x258   :  { %1196 = vsyncpa [#allocation4], 1 }

</bundles_post_ra>
